<compile_context>
chip_gen: v6e
topology: v6e:2x2x1
jax: 0.10.0
libtpu: 0.0.40
codegen_flags: <defaults>
</compile_context>

<pallas_src>
import functools

import jax
import jax.numpy as jnp
from jax.experimental import pallas as pl
from jax.experimental.pallas import tpu as pltpu


# ----------------------------------------------------------------------------
# helpers
# ----------------------------------------------------------------------------
def _cdiv(a, b):
    return -(-a // b)


def _round_up(n, m):
    return _cdiv(n, m) * m


# ----------------------------------------------------------------------------
# Fused kernel.
# refs: (x, w_cat, b_cat, w1, b1, ..., w_{n-1}, b_{n-1}, logits_out, encoded_out)
#   w_cat = [w_enc | w0] (bf16), b_cat = [0 | b0] (f32) -> one MXU pass over x
#   produces both `encoded` and the layer-0 pre-activation.
# ----------------------------------------------------------------------------
def _probe_kernel(x_ref, wcat_ref, bcat_ref, *rest, n_head_layers, enc_dim):
    logits_ref, encoded_ref = rest[-2], rest[-1]
    tail = rest[:-2]                      # (w1, b1, ..., w_{n-1}, b_{n-1})

    # Cast x to bf16 on the VPU inside the kernel (hidden under the matmul);
    # f32 accumulation on the MXU.
    x = x_ref[...].astype(jnp.bfloat16)
    y = jnp.dot(x, wcat_ref[...], preferred_element_type=jnp.float32) + bcat_ref[...]

    # Columns [0, enc_dim) are the synthetic-encoder output (bias part is zero).
    encoded_ref[...] = y[:, :enc_dim].astype(encoded_ref.dtype)

    # Columns [enc_dim, ...) are the first head layer's pre-activation.
    h = y[:, enc_dim:]
    if n_head_layers == 1:                # head == single Linear (no ReLU)
        logits_ref[...] = h.astype(logits_ref.dtype)
        return

    # ReLU in f32 on the VPU (v5e has no bf16 VPU); Dropout(p=0) elided.
    h = jnp.maximum(h, 0.0).astype(jnp.bfloat16)
    for i in range(n_head_layers - 1):
        w = tail[2 * i][...]              # bf16 (in, out)
        b = tail[2 * i + 1][...]          # f32  (1, out)
        z = jnp.dot(h, w, preferred_element_type=jnp.float32) + b
        if i < n_head_layers - 2:
            h = jnp.maximum(z, 0.0).astype(jnp.bfloat16)
        else:
            logits_ref[...] = z.astype(logits_ref.dtype)


# ----------------------------------------------------------------------------
# Probe forward
# ----------------------------------------------------------------------------
def probe_forward(x, head_weights, head_biases, w_enc, *, batch_tile=1024):
    """x: (B, embed_dim); head_weights[i]: (in_i, out_i); head_biases[i]: (1, out_i);
    w_enc: (embed_dim, enc_dim)."""
    assert len(head_weights) == len(head_biases)
    batch, embed_dim = x.shape
    n_layers = len(head_weights)
    num_classes = head_weights[-1].shape[1]
    enc_dim = w_enc.shape[1]

    # ---- batch tiling: big tiles, no padded-batch blowup, >=2 steps for v7x ----
    n_tiles = max(1, _cdiv(batch, batch_tile))
    if n_tiles == 1 and batch >= 32:
        n_tiles = 2                       # let v7x's second TensorCore help
    tm = _round_up(_cdiv(batch, n_tiles), 8)   # f32 sublane pack = 8 rows
    grid = (_cdiv(batch, tm),)            # Pallas clips the last partial block

    # ---- parameters (tiny; cast/concat in XLA is negligible) ----
    w0, b0 = head_weights[0], head_biases[0]
    w_cat = jnp.concatenate([w_enc, w0], axis=1).astype(jnp.bfloat16)       # (D, E+H0)
    b_cat = jnp.concatenate(
        [jnp.zeros((1, enc_dim), jnp.float32),
         b0.reshape(1, -1).astype(jnp.float32)], axis=1)                    # (1, E+H0)
    params = [w_cat, b_cat]
    for w, b in zip(head_weights[1:], head_biases[1:]):
        params.append(w.astype(jnp.bfloat16))
        params.append(b.reshape(1, -1).astype(jnp.float32))

    # ---- specs: x tiled over batch, params VMEM-resident (constant index_map) ----
    in_specs = [pl.BlockSpec((tm, embed_dim), lambda i: (i, 0))]
    for p in params:
        in_specs.append(pl.BlockSpec(p.shape, lambda i: (0, 0)))

    # Outputs at TRUE widths (last dim == full array dim satisfies the (8,128)
    # rule): masked stores but 4-8x fewer writeback bytes and no wrapper slices.
    out_specs = (
        pl.BlockSpec((tm, num_classes), lambda i: (i, 0)),
        pl.BlockSpec((tm, enc_dim), lambda i: (i, 0)),
    )
    out_shape = (
        jax.ShapeDtypeStruct((batch, num_classes), jnp.float32),
        jax.ShapeDtypeStruct((batch, enc_dim), jnp.float32),
    )

    kernel = functools.partial(
        _probe_kernel, n_head_layers=n_layers, enc_dim=enc_dim)

    logits, encoded = pl.pallas_call(
        kernel,
        out_shape=out_shape,
        grid=grid,
        in_specs=in_specs,
        out_specs=out_specs,
        compiler_params=pltpu.CompilerParams(
            dimension_semantics=("parallel",),   # batch steps independent
        ),
    )(x, *params)

    return {"logits": logits, "encoded": encoded}


probe_forward_jit = jax.jit(probe_forward, static_argnames=("batch_tile",))


def _ref_forward(x, head_weights, head_biases, w_enc):
    """Pure-JAX f32 reference for verification."""
    xf = x.astype(jnp.float32)
    encoded = xf @ w_enc.astype(jnp.float32)
    h = xf
    n = len(head_weights)
    for i, (w, b) in enumerate(zip(head_weights, head_biases)):
        h = h @ w.astype(jnp.float32) + b.astype(jnp.float32)
        if i < n - 1:
            h = jnp.maximum(h, 0.0)
    return {"logits": h, "encoded": encoded}


if __name__ == "__main__":
    # Small shapes consistent with the module:
    #   embed_dim=32 (encoder.embed_dim), layer_dims=[64], num_classes=16, batch=8
    batch = 8
    embed_dim = 32
    layer_dims = [64]
    num_classes = 16
    enc_dim = 32

    key = jax.random.PRNGKey(0)
    keys = jax.random.split(key, 8)

    x = jax.random.normal(keys[0], (batch, embed_dim), dtype=jnp.float32)

    # Deterministic head parameters (Linear layers: weight stored (in, out)).
    head_weights, head_biases = [], []
    in_f = embed_dim
    dims = layer_dims + [num_classes]
    for i, d in enumerate(dims):
        w = jax.random.normal(keys[1 + i], (in_f, d), dtype=jnp.float32) * 0.05
        b = jax.random.normal(keys[4 + i], (1, d), dtype=jnp.float32) * 0.01
        head_weights.append(w)
        head_biases.append(b)
        in_f = d

    # Deterministic synthetic encoder weight.
    w_enc = jax.random.normal(keys[7], (embed_dim, enc_dim), dtype=jnp.float32) * 0.05

    out = probe_forward_jit(x, tuple(head_weights), tuple(head_biases), w_enc)
    jax.block_until_ready(out)

    ref = _ref_forward(x, head_weights, head_biases, w_enc)
    assert out["logits"].shape == (batch, num_classes)
    assert out["encoded"].shape == (batch, enc_dim)
    # bf16 MXU inputs (f32 accumulation) -> loosened tolerance vs. the f32 reference.
    assert jnp.allclose(out["logits"], ref["logits"], atol=2e-2, rtol=2e-2)
    assert jnp.allclose(out["encoded"], ref["encoded"], atol=2e-2, rtol=2e-2)

    print("KERNEL_OK")
</pallas_src>

<mosaic_0001>
module attributes {stable_mosaic.version = 11 : i64} {
  func.func @_probe_kernel(%arg0: i32, %arg1: memref<8x32xf32, #tpu.memory_space<vmem>>, %arg2: memref<32x96xbf16, #tpu.memory_space<vmem>>, %arg3: memref<1x96xf32, #tpu.memory_space<vmem>>, %arg4: memref<64x16xbf16, #tpu.memory_space<vmem>>, %arg5: memref<1x16xf32, #tpu.memory_space<vmem>>, %arg6: memref<8x16xf32, #tpu.memory_space<vmem>>, %arg7: memref<8x32xf32, #tpu.memory_space<vmem>>) attributes {dimension_semantics = [#tpu.dimension_semantics<parallel>], iteration_bounds = array<i64: 1>, scalar_prefetch = 0 : i64, scratch_operands = 0 : i64, tpu.core_type = #tpu.core_type<tc>, window_params = [{transform_indices = @transform_0, window_bounds = array<i64: 8, 32>}, {pipeline_mode = #tpu.pipeline_mode<synchronous>, transform_indices = @transform_1, window_bounds = array<i64: 32, 96>}, {pipeline_mode = #tpu.pipeline_mode<synchronous>, transform_indices = @transform_2, window_bounds = array<i64: 1, 96>}, {pipeline_mode = #tpu.pipeline_mode<synchronous>, transform_indices = @transform_3, window_bounds = array<i64: 64, 16>}, {pipeline_mode = #tpu.pipeline_mode<synchronous>, transform_indices = @transform_4, window_bounds = array<i64: 1, 16>}, {transform_indices = @transform_5, window_bounds = array<i64: 8, 16>}, {transform_indices = @transform_6, window_bounds = array<i64: 8, 32>}]} {
    %c0 = arith.constant 0 : index
    %c0_0 = arith.constant 0 : index
    %0 = vector.load %arg1[%c0, %c0_0] : memref<8x32xf32, #tpu.memory_space<vmem>>, vector<8x32xf32>
    %1 = arith.truncf %0 : vector<8x32xf32> to vector<8x32xbf16>
    %c0_1 = arith.constant 0 : index
    %c0_2 = arith.constant 0 : index
    %2 = vector.load %arg2[%c0_1, %c0_2] : memref<32x96xbf16, #tpu.memory_space<vmem>>, vector<32x96xbf16>
    %cst = arith.constant dense<0.000000e+00> : vector<8x96xf32>
    %3 = tpu.matmul %1, %2, %cst {dimension_numbers = #tpu.dot_dimension_numbers<[1], [0], [0], [1], [0, 0, 1, 1], [], []>} : vector<8x32xbf16>, vector<32x96xbf16>, vector<8x96xf32> -> vector<8x96xf32>
    %c0_3 = arith.constant 0 : index
    %c0_4 = arith.constant 0 : index
    %4 = vector.load %arg3[%c0_3, %c0_4] : memref<1x96xf32, #tpu.memory_space<vmem>>, vector<1x96xf32>
    %5 = vector.broadcast %4 : vector<1x96xf32> to vector<8x96xf32>
    %6 = arith.addf %3, %5 : vector<8x96xf32>
    %7 = vector.extract_strided_slice %6 {offsets = [0, 0], sizes = [8, 32], strides = [1, 1]} : vector<8x96xf32> to vector<8x32xf32>
    %c0_5 = arith.constant 0 : index
    %c0_6 = arith.constant 0 : index
    %8 = vector.load %arg7[%c0_5, %c0_6] : memref<8x32xf32, #tpu.memory_space<vmem>>, vector<8x32xf32>
    tpu.vector_store %arg7[%c0_5, %c0_6], %7 {strides = array<i32>} : memref<8x32xf32, #tpu.memory_space<vmem>>, vector<8x32xf32>,
    %9 = vector.extract_strided_slice %6 {offsets = [0, 32], sizes = [8, 64], strides = [1, 1]} : vector<8x96xf32> to vector<8x64xf32>
    %cst_7 = arith.constant 0.000000e+00 : f32
    %10 = vector.broadcast %cst_7 : f32 to vector<8x64xf32>
    %11 = arith.maximumf %9, %10 : vector<8x64xf32>
    %12 = arith.truncf %11 : vector<8x64xf32> to vector<8x64xbf16>
    %c0_8 = arith.constant 0 : index
    %c0_9 = arith.constant 0 : index
    %13 = vector.load %arg4[%c0_8, %c0_9] : memref<64x16xbf16, #tpu.memory_space<vmem>>, vector<64x16xbf16>
    %c0_10 = arith.constant 0 : index
    %c0_11 = arith.constant 0 : index
    %14 = vector.load %arg5[%c0_10, %c0_11] : memref<1x16xf32, #tpu.memory_space<vmem>>, vector<1x16xf32>
    %cst_12 = arith.constant dense<0.000000e+00> : vector<8x16xf32>
    %15 = tpu.matmul %12, %13, %cst_12 {dimension_numbers = #tpu.dot_dimension_numbers<[1], [0], [0], [1], [0, 0, 1, 1], [], []>} : vector<8x64xbf16>, vector<64x16xbf16>, vector<8x16xf32> -> vector<8x16xf32>
    %16 = vector.broadcast %14 : vector<1x16xf32> to vector<8x16xf32>
    %17 = arith.addf %15, %16 : vector<8x16xf32>
    %c0_13 = arith.constant 0 : index
    %c0_14 = arith.constant 0 : index
    %18 = vector.load %arg6[%c0_13, %c0_14] : memref<8x16xf32, #tpu.memory_space<vmem>>, vector<8x16xf32>
    tpu.vector_store %arg6[%c0_13, %c0_14], %17 {strides = array<i32>} : memref<8x16xf32, #tpu.memory_space<vmem>>, vector<8x16xf32>,
    return
  }
  func.func @transform_0(%arg0: i32) -> (i32, i32) {
    %c0_i32 = arith.constant 0 : i32
    %c0_i32_0 = arith.constant 0 : i32
    return %arg0, %c0_i32 : i32, i32
  }
  func.func @transform_1(%arg0: i32) -> (i32, i32) {
    %c0_i32 = arith.constant 0 : i32
    %c0_i32_0 = arith.constant 0 : i32
    %c0_i32_1 = arith.constant 0 : i32
    return %c0_i32, %c0_i32_0 : i32, i32
  }
  func.func @transform_2(%arg0: i32) -> (i32, i32) {
    %c0_i32 = arith.constant 0 : i32
    %c0_i32_0 = arith.constant 0 : i32
    %c0_i32_1 = arith.constant 0 : i32
    return %c0_i32, %c0_i32_0 : i32, i32
  }
  func.func @transform_3(%arg0: i32) -> (i32, i32) {
    %c0_i32 = arith.constant 0 : i32
    %c0_i32_0 = arith.constant 0 : i32
    %c0_i32_1 = arith.constant 0 : i32
    return %c0_i32, %c0_i32_0 : i32, i32
  }
  func.func @transform_4(%arg0: i32) -> (i32, i32) {
    %c0_i32 = arith.constant 0 : i32
    %c0_i32_0 = arith.constant 0 : i32
    %c0_i32_1 = arith.constant 0 : i32
    return %c0_i32, %c0_i32_0 : i32, i32
  }
  func.func @transform_5(%arg0: i32) -> (i32, i32) {
    %c0_i32 = arith.constant 0 : i32
    %c0_i32_0 = arith.constant 0 : i32
    return %arg0, %c0_i32 : i32, i32
  }
  func.func @transform_6(%arg0: i32) -> (i32, i32) {
    %c0_i32 = arith.constant 0 : i32
    %c0_i32_0 = arith.constant 0 : i32
    return %arg0, %c0_i32 : i32, i32
  }
}

</mosaic_0001>

<bundles_post_ra>
// kernel: probe_forward.1
= control target key start
LH: loop header
LB: loop body
LE: loop exit
PB: predicated region body
PF: predicated region fallthrough
CT: control target
= control target key end

     0   :  { %12 = vsyncpa [#allocation3], 0  ;;  %v306_v1 = vmov 0.0   ;;  %vm307_vm0 = vmmov 0   ;;  %s381_s0 = inlined_call_operand.vmem [shape: f32[8,32], index: 0, kind: input, shape index: {}]   ;;  %s382_s1 = inlined_call_operand.vmem [shape: bf16[32,96], index: 1, kind: input, shape index: {}]   ;;  %s383_s2 = inlined_call_operand.vmem [shape: f32[1,96], index: 2, kind: input, shape index: {}]   ;;  %s384_s3 = inlined_call_operand.vmem [shape: bf16[64,16], index: 3, kind: input, shape index: {}]   ;;  %s385_s4 = inlined_call_operand.vmem [shape: f32[1,16], index: 4, kind: input, shape index: {}]   ;;  %s386_s5 = inlined_call_operand.hbm [shape: f32[8,16], index: 5, kind: output, shape index: {0}]   ;;  %s387_s6 = inlined_call_operand.hbm [shape: f32[8,32], index: 6, kind: output, shape index: {1}]  }
   0x1   :  { %v256_v0 = vld [vmem:[%s382_s1 + $0x8] sm:$0xff]   ;;  %231 = vmatprep.subr.bf16.mxu0 %v306_v1  ;;  %239 = vmatprep.subr.bf16.mxu1 %v306_v1  ;;  %v257_v2 = vld [vmem:[%s382_s1] sm:$0xff]  }
   0x2   :  { %232 = vmatpush3.bf16.msra.mxu0 %v256_v0  ;;  %235 = vmatprep.mubr.msk.bf16.mxu0 %vm307_vm0, %v306_v1  ;;  %v25_v3 = vld [vmem:[%s381_s0] sm:$0xff] }
   0x3   :  { %233 = vmatprep.subr.bf16.mxu0 %v306_v1  ;;  %247 = vmatprep.mubr.msk.bf16.mxu1 %vm307_vm0, %v306_v1  ;;  %v26_v4 = vpack.c.bf16 %v25_v3, %v25_v3 }
   0x4   :  { %13 = vsyncpa [#allocation5], 0  ;;  %vm50_vm1 = vcmask 261120   ;;  %v258_v5 = vld [vmem:[%s384_s3 + $0x18] sm:$0xff]   ;;  %v259_v6 = vld [vmem:[%s384_s3 + $0x10] sm:$0xff]   ;;  %s308_s11 = smov 96  }
   0x5   :  { %240 = vmatpush3.bf16.msra.mxu1 %v258_v5  ;;  %v260_v7 = vld [vmem:[%s384_s3 + $0x8] sm:$0xff]   ;;  %v261_v8 = vld [vmem:[%s384_s3] sm:$0xff]   ;;  %vm139_vm2 = vcmask 523264   ;;  %s309_s3 = smov [#allocation4]  }
   0x6   :  { %234 = vmatpush3.bf16.msra.mxu0 %v257_v2  ;;  %241 = vmatprep.subr.bf16.mxu1 %v306_v1  ;;  %v213_v9 = vld [vmem:[%s383_s2] ss:$0 sm:$0xff]  ;;  %s201_s12 = sshll.u32 %s309_s3, 4  ;;  %s202_s12 = int_to_ptr.vmem [resolvable:$true] %s201_s12 }
   0x7   :  { %s262_s13 = scalar_lea.vmem %s202_s12, 128  ;;  %p267_p1 = scmp.lt.s32.totalorder %s202_s12, %s202_s12 }
   0x8   :  { %p263_p0 = scmp.ne.s32.totalorder %s202_s12, %s262_s13  ;;  %p268_p2 = scmp.lt.s32.totalorder %s262_s13, %s262_s13 }
   0x9   :  { %236 = vmatmul.mubr.msk.bf16.vlgmr.msra.gmra.mxu0 %vm50_vm1, %v26_v4  ;;  %242 = vmatpush3.bf16.msra.mxu1 %v259_v6 }
   0xa   :  { %243 = vmatprep.subr.bf16.mxu1 %v306_v1  ;;  %p269_p3 = por %p268_p2, %p267_p1 }
   0xc   :  { %p270_p4 = pnand %p269_p3, %p263_p0 }
   0xd   :  { %244 = vmatpush3.bf16.msra.mxu1 %v260_v7 }
   0xe   :  { %245 = vmatprep.subr.bf16.mxu1 %v306_v1 }
  0x11   :  { %246 = vmatpush3.bf16.msra.mxu1 %v261_v8 }
  0xc9   :  { %v88_v10 = vpop.f32.mrf.mxu0 }
  0xca   :  { %v89_v11 = vadd.f32 %v213_v9, %v88_v10 }
  0xcb   :  { %v237_v12 = vpop.f32.mrf.mxu0 }
  0xcc   :  { %94 = vst.msk [vmem:[#allocation4] sm:$0xff] %vm50_vm1, %v89_v11  ;;  %v95_v13 = vmax.f32 %v89_v11, 0.0 }
  0xcd   :  { %v91_v14 = vpop.f32.mrf.mxu0 }
  0xce   :  { %v96_v15 = vpack.c.bf16 %v95_v13, %v95_v13 }
  0xcf   :  { %v238_v16 = vpop.f32.mrf.mxu0 }
  0xd0   :  { %113 = vrot.lane.b32.xlu0 %v96_v15, %s308_s11 }
 0x142   :  { %v114_v17 = vpop.permute.xlu0 %113 }
 0x143   :  { %248 = vmatmul.mubr.msk.bf16.vlgmr.msra.gmra.mxu1 %vm139_vm2, %v114_v17 }
 0x144   :  { %273 = shalt.err (!%p270_p4)
}
 0x145   :  { %204 = dma.vmem_to_hbm [thread:$0]  %s202_s12, 128, %s387_s6, [#allocation5]   ;;  %v217_v18 = vld [vmem:[%s385_s4] ss:$0 sm:$0xff]  ;;  %vm183_vm3 = vcmask 130048  }
 0x146   :  { %s310_s17 = smov [#allocation2]  }
 0x147   :  { %s191_s18 = sshll.u32 %s310_s17, 4  ;;  %s192_s18 = int_to_ptr.vmem [resolvable:$true] %s191_s18 }
 0x148   :  { %s282_s19 = scalar_lea.vmem %s192_s18, 128  ;;  %p287_p6 = scmp.lt.s32.totalorder %s192_s18, %s192_s18 }
 0x149   :  { %p283_p5 = scmp.ne.s32.totalorder %s192_s18, %s282_s19  ;;  %p288_p7 = scmp.lt.s32.totalorder %s282_s19, %s282_s19 }
 0x14b   :  { %p289_p8 = por %p288_p7, %p287_p6 }
 0x14d   :  { %p290_p9 = pnand %p289_p8, %p283_p5 }
 0x203   :  { %v177_v19 = vpop.f32.mrf.mxu1 }
 0x204   :  { %v178_v20 = vadd.f32 %v217_v18, %v177_v19 }
 0x205   :  { %v249_v21 = vpop.f32.mrf.mxu1 }
 0x206   :  { %184 = vst.msk [vmem:[#allocation2] sm:$0xff] %vm183_vm3, %v178_v20 }
 0x207   :  { %v180_v22 = vpop.f32.mrf.mxu1 }
 0x208   :  { %293 = shalt.err (!%p290_p9)
}
 0x209   :  { %194 = dma.vmem_to_hbm [thread:$0]  %s192_s18, 128, %s386_s5, [#allocation3]   ;;  %v250_v23 = vpop.f32.mrf.mxu1 }
 0x20a   :  { %302 = dma.done.wait [#allocation3], 128  }
 0x20b   :  { %303 = vsyncadd [#allocation3], 4294967168 }
 0x20c   :  { %304 = dma.done.wait [#allocation5], 128  }
 0x20d   :  { %305 = vsyncadd [#allocation5], 4294967168 }
 0x20e   :  { %211 = vsyncpa [#allocation3], 1 }
 0x20f   :  { %212 = vsyncpa [#allocation5], 1 }

</bundles_post_ra>
